<compile_context>
chip_gen: v7x
topology: tpu7x:2x2x1
jax: 0.10.0
libtpu: 0.0.40
codegen_flags: <defaults>
</compile_context>

<pallas_src>
import functools

import jax
import jax.numpy as jnp
from jax import lax
from jax.experimental import pallas as pl
from jax.experimental.pallas import tpu as pltpu


def _round_up(x: int, m: int) -> int:
    return ((x + m - 1) // m) * m


def ff_attention_kernel(q_ref, k_ref, v_ref, w1q_ref, w1k_ref, b1_ref, w2_ref,
                        o_ref, acc_ref, *, q_chunk, ew_dtype):
    # Block shapes:
    #   q_ref : (1, TQ, Dq_p)   k_ref : (1, TK, Dk_p)   v_ref : (1, TK, Dv_p)
    #   w1q   : (Dq_p, Hp)      w1k   : (Dk_p, Hp)
    #   b1    : (1, Hp)         w2    : (1, Hp)   (1/sqrt(Dq) already folded in)
    #   o_ref : (1, TQ, Dv_p)   acc_ref: (TQ, Dv_p) f32 scratch
    ki = pl.program_id(2)

    @pl.when(ki == 0)
    def _init():
        acc_ref[...] = jnp.zeros_like(acc_ref)

    k = k_ref[0]                                                    # (TK, Dk_p)
    v = v_ref[0]                                                    # (TK, Dv_p)

    # Key-side half of Linear1([q;k]); shared by every q-chunk of this tile (MXU).
    bk = jnp.dot(k, w1k_ref[...],
                 preferred_element_type=jnp.float32).astype(ew_dtype)   # (TK, Hp)
    w2 = w2_ref[...].astype(ew_dtype)                                   # (1, Hp)
    b1 = b1_ref[...]                                                    # (1, Hp) f32

    tq = q_ref.shape[1]
    num_chunks = tq // q_chunk

    def chunk_body(c, carry):
        r0 = pl.multiple_of(c * q_chunk, q_chunk)
        q_c = q_ref[0, pl.ds(r0, q_chunk), :]                           # (qc, Dq_p)
        # Query-side half of Linear1 (+ bias), MXU, f32 accumulate.
        a_c = (jnp.dot(q_c, w1q_ref[...], preferred_element_type=jnp.float32)
               + b1).astype(ew_dtype)                                   # (qc, Hp)
        # Pairwise hidden activations for this (q-chunk, k-tile): VPU add + EUP sigmoid.
        h = jax.nn.sigmoid(a_c[:, None, :] + bk[None, :, :])            # (qc, TK, Hp)
        # H-contraction weighted by (scaled) w2: lane-dense VPU mul + XLU reduce.
        s_c = jnp.sum((h * w2).astype(jnp.float32), axis=-1)            # (qc, TK)
        # scores @ value on the MXU, accumulated in f32.
        acc_ref[pl.ds(r0, q_chunk), :] += jnp.dot(
            s_c, v, preferred_element_type=jnp.float32)
        return carry

    lax.fori_loop(0, num_chunks, chunk_body, 0, unroll=True)

    @pl.when(ki == pl.num_programs(2) - 1)
    def _finalize():
        o_ref[0] = acc_ref[...].astype(o_ref.dtype)


def feedforward_attention(query, key, value, w1q, w1k, b1, w2, b2,
                          *, tile_q=128, tile_k=128, q_chunk=8,
                          elementwise_dtype=jnp.float32):
    """Feed-forward attention forward pass.

    query: (B, Lq, Dq), key: (B, Lk, Dk), value: (B, Lk, Dv)
    w1q: (Dq, H), w1k: (Dk, H)  -- row-split of the Linear(Dq+Dk, H) weight
    b1:  (1, H),  w2: (1, H),  b2: (1, 1)
    elementwise_dtype: jnp.float32 (exact; use on v5e) or jnp.bfloat16 (v6e/v7x).
    """
    B, Lq, Dq = query.shape
    _, Lk, Dk = key.shape
    _, _, Dv = value.shape
    H = w1q.shape[1]
    scale = 1.0 / (Dq ** 0.5)            # PyTorch uses query.size(-1) (unpadded Dq)

    # ---- lane-dense padding: feature dims -> x128, sequence dims -> tile multiples ----
    dq_p = _round_up(Dq, 128)
    dk_p = _round_up(Dk, 128)
    dv_p = _round_up(Dv, 128)
    h_p = _round_up(H, 128)

    tq = min(tile_q, _round_up(Lq, 8))
    tk = min(tile_k, _round_up(Lk, 8))
    qc = min(q_chunk, tq)
    assert tq % qc == 0 and tq % 8 == 0 and tk % 8 == 0
    lq_p = _round_up(Lq, tq)
    lk_p = _round_up(Lk, tk)

    def pad3(x, length, depth):
        return jnp.pad(x, ((0, 0), (0, length - x.shape[1]), (0, depth - x.shape[2])))

    q_p = pad3(query, lq_p, dq_p)
    k_p = pad3(key, lk_p, dk_p)
    v_p = pad3(value, lk_p, dv_p)

    w1q_p = jnp.pad(w1q, ((0, dq_p - Dq), (0, h_p - H)))
    w1k_p = jnp.pad(w1k, ((0, dk_p - Dk), (0, h_p - H)))
    b1_p = jnp.pad(b1, ((0, 0), (0, h_p - H)))
    # Fold the 1/sqrt(Dq) scale into w2; zero-padded H lanes contribute sigmoid(.)*0 = 0.
    w2_p = jnp.pad(w2 * scale, ((0, 0), (0, h_p - H)))

    grid = (B, lq_p // tq, lk_p // tk)
    n_q, n_k = grid[1], grid[2]

    kernel = functools.partial(ff_attention_kernel, q_chunk=qc,
                               ew_dtype=elementwise_dtype)

    # Advisory cost: this kernel is EUP/VPU bound (sigmoid over B*Lq*Lk*H), not matmul bound.
    cost = pl.CostEstimate(
        flops=int(3 * B * lq_p * lk_p * h_p              # broadcast-add, *w2, reduce
                  + 2 * B * lq_p * lk_p * dv_p           # scores @ v
                  + 2 * B * n_k * lq_p * dq_p * h_p      # q @ W1q (per k-tile)
                  + 2 * B * n_q * lk_p * dk_p * h_p),    # k @ W1k (per q-tile)
        transcendentals=int(B * lq_p * lk_p * h_p),
        bytes_accessed=int(4 * (q_p.size * n_k + k_p.size * n_q + v_p.size * n_q
                                + B * lq_p * dv_p)),
    )

    out_p = pl.pallas_call(
        kernel,
        out_shape=jax.ShapeDtypeStruct((B, lq_p, dv_p), query.dtype),
        grid_spec=pltpu.PrefetchScalarGridSpec(
            num_scalar_prefetch=0,
            grid=grid,
            in_specs=[
                pl.BlockSpec((1, tq, dq_p), lambda b, qi, ki: (b, qi, 0)),
                pl.BlockSpec((1, tk, dk_p), lambda b, qi, ki: (b, ki, 0)),
                pl.BlockSpec((1, tk, dv_p), lambda b, qi, ki: (b, ki, 0)),
                # Weights: constant block index -> fetched once, kept resident.
                pl.BlockSpec((dq_p, h_p), lambda b, qi, ki: (0, 0)),
                pl.BlockSpec((dk_p, h_p), lambda b, qi, ki: (0, 0)),
                pl.BlockSpec((1, h_p), lambda b, qi, ki: (0, 0)),
                pl.BlockSpec((1, h_p), lambda b, qi, ki: (0, 0)),
            ],
            out_specs=pl.BlockSpec((1, tq, dv_p), lambda b, qi, ki: (b, qi, 0)),
            scratch_shapes=[pltpu.VMEM((tq, dv_p), jnp.float32)],
        ),
        compiler_params=pltpu.CompilerParams(
            dimension_semantics=("parallel", "parallel", "arbitrary"),
            vmem_limit_bytes=32 * 1024 * 1024,
        ),
        cost_estimate=cost,
    )(q_p, k_p, v_p, w1q_p, w1k_p, b1_p, w2_p)

    out = out_p[:, :Lq, :Dv]
    # b2 contribution:  sum_k (b2*scale) * v[k, :]  -- independent of the query position,
    # added outside the kernel so b2 never occupies a padded/double-buffered VMEM tile.
    out = out + (b2[0, 0] * scale) * jnp.sum(value, axis=1, keepdims=True)
    return out


def reference_feedforward_attention(query, key, value, w1q, w1k, b1, w2, b2):
    """Plain-JAX mirror of the PyTorch forward (expand + concat + MLP)."""
    B, Lq, Dq = query.shape
    _, Lk, Dk = key.shape
    q_exp = jnp.broadcast_to(query[:, :, None, :], (B, Lq, Lk, Dq))
    k_exp = jnp.broadcast_to(key[:, None, :, :], (B, Lq, Lk, Dk))
    cat = jnp.concatenate([q_exp, k_exp], axis=-1)                     # (B, Lq, Lk, Dq+Dk)
    w1 = jnp.concatenate([w1q, w1k], axis=0)                           # (Dq+Dk, H)
    h = jax.nn.sigmoid(cat @ w1 + b1[0])                               # (B, Lq, Lk, H)
    scores = (h @ w2[0] + b2[0, 0]) / (Dq ** 0.5)                      # (B, Lq, Lk)
    return scores @ value                                              # (B, Lq, Dv)


def _make_inputs(rng, B, Lq, Lk, Dq, Dk, Dv, H):
    kq, kk, kv, kw1, kb1, kw2, kb2 = jax.random.split(rng, 7)
    query = jax.random.normal(kq, (B, Lq, Dq), dtype=jnp.float32)
    key_t = jax.random.normal(kk, (B, Lk, Dk), dtype=jnp.float32)
    value = jax.random.normal(kv, (B, Lk, Dv), dtype=jnp.float32)
    w1 = jax.random.normal(kw1, (Dq + Dk, H), dtype=jnp.float32) * 0.1
    w1q, w1k = w1[:Dq], w1[Dq:]
    b1 = jax.random.normal(kb1, (1, H), dtype=jnp.float32) * 0.1
    w2 = jax.random.normal(kw2, (1, H), dtype=jnp.float32) * 0.1
    b2 = jax.random.normal(kb2, (1, 1), dtype=jnp.float32) * 0.1
    return query, key_t, value, w1q, w1k, b1, w2, b2


if __name__ == "__main__":
    # Test 1: small aligned-ish shapes (B=2, Lq=Lk=8, Dq=Dk=Dv=16, H=32), f32 path.
    rng = jax.random.PRNGKey(0)
    r1, r2 = jax.random.split(rng)

    args1 = _make_inputs(r1, B=2, Lq=8, Lk=8, Dq=16, Dk=16, Dv=16, H=32)
    out1 = jax.block_until_ready(feedforward_attention(*args1))
    ref1 = reference_feedforward_attention(*args1)
    assert out1.shape == ref1.shape == (2, 8, 16)
    assert jnp.allclose(out1, ref1, atol=1e-4, rtol=1e-3), "f32 mismatch vs reference"

    # Test 2: irregular shapes exercising padding + multi-chunk loop, f32 path.
    args2 = _make_inputs(r2, B=3, Lq=20, Lk=12, Dq=16, Dk=24, Dv=8, H=48)
    out2 = jax.block_until_ready(feedforward_attention(*args2))
    ref2 = reference_feedforward_attention(*args2)
    assert out2.shape == ref2.shape == (3, 20, 8)
    assert jnp.allclose(out2, ref2, atol=1e-4, rtol=1e-3), "f32 irregular mismatch"

    # Test 3: bf16 elementwise path (recommended on v6e/v7x); tolerance relaxed for bf16.
    out3 = jax.block_until_ready(
        feedforward_attention(*args2, elementwise_dtype=jnp.bfloat16))
    assert jnp.allclose(out3, ref2, atol=1e-1, rtol=1e-1), "bf16 mismatch vs reference"

    # TODO(synk): key_padding_mask / softmax=True / dropout and the 'multi-head' /
    # 'scaled-dot-product' attention_type branches are not exercised (PyTorch defaults).
    print("KERNEL_OK")
</pallas_src>

<mosaic_0001>
module attributes {stable_mosaic.version = 11 : i64} {
  func.func @ff_attention_kernel(%arg0: i32, %arg1: i32, %arg2: i32, %arg3: memref<1x8x128xf32, #tpu.memory_space<vmem>>, %arg4: memref<1x8x128xf32, #tpu.memory_space<vmem>>, %arg5: memref<1x8x128xf32, #tpu.memory_space<vmem>>, %arg6: memref<128x128xf32, #tpu.memory_space<vmem>>, %arg7: memref<128x128xf32, #tpu.memory_space<vmem>>, %arg8: memref<1x128xf32, #tpu.memory_space<vmem>>, %arg9: memref<1x128xf32, #tpu.memory_space<vmem>>, %arg10: memref<1x8x128xf32, #tpu.memory_space<vmem>>, %arg11: memref<8x128xf32, #tpu.memory_space<vmem>>) attributes {dimension_semantics = [#tpu.dimension_semantics<parallel>, #tpu.dimension_semantics<parallel>, #tpu.dimension_semantics<arbitrary>], iteration_bounds = array<i64: 2, 1, 1>, scalar_prefetch = 0 : i64, scratch_operands = 1 : i64, tpu.core_type = #tpu.core_type<tc>, window_params = [{transform_indices = @transform_0, window_bounds = array<i64: 1, 8, 128>}, {transform_indices = @transform_1, window_bounds = array<i64: 1, 8, 128>}, {transform_indices = @transform_2, window_bounds = array<i64: 1, 8, 128>}, {pipeline_mode = #tpu.pipeline_mode<synchronous>, transform_indices = @transform_3, window_bounds = array<i64: 128, 128>}, {pipeline_mode = #tpu.pipeline_mode<synchronous>, transform_indices = @transform_4, window_bounds = array<i64: 128, 128>}, {pipeline_mode = #tpu.pipeline_mode<synchronous>, transform_indices = @transform_5, window_bounds = array<i64: 1, 128>}, {pipeline_mode = #tpu.pipeline_mode<synchronous>, transform_indices = @transform_6, window_bounds = array<i64: 1, 128>}, {transform_indices = @transform_7, window_bounds = array<i64: 1, 8, 128>}]} {
    %c0_i32 = arith.constant 0 : i32
    %0 = arith.cmpi eq, %arg2, %c0_i32 : i32
    %1 = arith.extui %0 : i1 to i32
    %c0_i32_0 = arith.constant 0 : i32
    %2 = arith.cmpi ne, %1, %c0_i32_0 : i32
    scf.if %2 {
      %cst_25 = arith.constant 0.000000e+00 : f32
      %43 = vector.broadcast %cst_25 : f32 to vector<8x128xf32>
      %c0_26 = arith.constant 0 : index
      %c0_27 = arith.constant 0 : index
      %44 = vector.load %arg11[%c0_26, %c0_27] : memref<8x128xf32, #tpu.memory_space<vmem>>, vector<8x128xf32>
      tpu.vector_store %arg11[%c0_26, %c0_27], %43 {strides = array<i32>} : memref<8x128xf32, #tpu.memory_space<vmem>>, vector<8x128xf32>,
    } else {
    }
    %c0 = arith.constant 0 : index
    %c0_1 = arith.constant 0 : index
    %c0_2 = arith.constant 0 : index
    %3 = vector.load %arg4[%c0, %c0_1, %c0_2] : memref<1x8x128xf32, #tpu.memory_space<vmem>>, vector<1x8x128xf32>
    %4 = vector.shape_cast %3 : vector<1x8x128xf32> to vector<8x128xf32>
    %c0_3 = arith.constant 0 : index
    %c0_4 = arith.constant 0 : index
    %c0_5 = arith.constant 0 : index
    %5 = vector.load %arg5[%c0_3, %c0_4, %c0_5] : memref<1x8x128xf32, #tpu.memory_space<vmem>>, vector<1x8x128xf32>
    %6 = vector.shape_cast %5 : vector<1x8x128xf32> to vector<8x128xf32>
    %c0_6 = arith.constant 0 : index
    %c0_7 = arith.constant 0 : index
    %7 = vector.load %arg7[%c0_6, %c0_7] : memref<128x128xf32, #tpu.memory_space<vmem>>, vector<128x128xf32>
    %cst = arith.constant dense<0.000000e+00> : vector<8x128xf32>
    %8 = tpu.matmul %4, %7, %cst {dimension_numbers = #tpu.dot_dimension_numbers<[1], [0], [0], [1], [0, 0, 1, 1], [], []>} : vector<8x128xf32>, vector<128x128xf32>, vector<8x128xf32> -> vector<8x128xf32>
    %c0_8 = arith.constant 0 : index
    %c0_9 = arith.constant 0 : index
    %9 = vector.load %arg9[%c0_8, %c0_9] : memref<1x128xf32, #tpu.memory_space<vmem>>, vector<1x128xf32>
    %c0_10 = arith.constant 0 : index
    %c0_11 = arith.constant 0 : index
    %10 = vector.load %arg8[%c0_10, %c0_11] : memref<1x128xf32, #tpu.memory_space<vmem>>, vector<1x128xf32>
    %c0_i32_12 = arith.constant 0 : i32
    %c8_i32 = arith.constant 8 : i32
    %11 = arith.muli %c0_i32_12, %c8_i32 : i32
    %12 = tpu.assume_multiple %11, 8 : i32
    %c0_13 = arith.constant 0 : index
    %13 = arith.index_cast %12 : i32 to index
    %c0_14 = arith.constant 0 : index
    %14 = vector.load %arg3[%c0_13, %13, %c0_14] : memref<1x8x128xf32, #tpu.memory_space<vmem>>, vector<1x8x128xf32>
    %15 = vector.shape_cast %14 : vector<1x8x128xf32> to vector<8x128xf32>
    %c0_15 = arith.constant 0 : index
    %c0_16 = arith.constant 0 : index
    %16 = vector.load %arg6[%c0_15, %c0_16] : memref<128x128xf32, #tpu.memory_space<vmem>>, vector<128x128xf32>
    %cst_17 = arith.constant dense<0.000000e+00> : vector<8x128xf32>
    %17 = tpu.matmul %15, %16, %cst_17 {dimension_numbers = #tpu.dot_dimension_numbers<[1], [0], [0], [1], [0, 0, 1, 1], [], []>} : vector<8x128xf32>, vector<128x128xf32>, vector<8x128xf32> -> vector<8x128xf32>
    %18 = vector.broadcast %10 : vector<1x128xf32> to vector<8x128xf32>
    %19 = arith.addf %17, %18 : vector<8x128xf32>
    %20 = vector.shape_cast %19 : vector<8x128xf32> to vector<8x1x128xf32>
    %21 = vector.shape_cast %8 : vector<8x128xf32> to vector<1x8x128xf32>
    %22 = vector.broadcast %20 : vector<8x1x128xf32> to vector<8x8x128xf32>
    %23 = vector.broadcast %21 : vector<1x8x128xf32> to vector<8x8x128xf32>
    %24 = arith.addf %22, %23 : vector<8x8x128xf32>
    %25 = arith.negf %24 : vector<8x8x128xf32>
    %26 = math.exp %25 : vector<8x8x128xf32>
    %cst_18 = arith.constant 1.000000e+00 : f32
    %27 = vector.broadcast %cst_18 : f32 to vector<8x8x128xf32>
    %28 = arith.addf %27, %26 : vector<8x8x128xf32>
    %29 = arith.divf %27, %28 : vector<8x8x128xf32>
    %30 = vector.shape_cast %9 : vector<1x128xf32> to vector<1x1x128xf32>
    %31 = vector.broadcast %30 : vector<1x1x128xf32> to vector<8x8x128xf32>
    %32 = arith.mulf %29, %31 : vector<8x8x128xf32>
    %cst_19 = arith.constant dense<0.000000e+00> : vector<8x8xf32>
    %33 = vector.multi_reduction <add>, %32, %cst_19 [2] : vector<8x8x128xf32> to vector<8x8xf32>
    %34 = arith.index_cast %12 : i32 to index
    %c0_20 = arith.constant 0 : index
    %35 = vector.load %arg11[%34, %c0_20] : memref<8x128xf32, #tpu.memory_space<vmem>>, vector<8x128xf32>
    %cst_21 = arith.constant dense<0.000000e+00> : vector<8x128xf32>
    %36 = tpu.matmul %33, %6, %cst_21 {dimension_numbers = #tpu.dot_dimension_numbers<[1], [0], [0], [1], [0, 0, 1, 1], [], []>} : vector<8x8xf32>, vector<8x128xf32>, vector<8x128xf32> -> vector<8x128xf32>
    %37 = arith.addf %35, %36 : vector<8x128xf32>
    %38 = arith.index_cast %12 : i32 to index
    %c0_22 = arith.constant 0 : index
    %39 = vector.load %arg11[%38, %c0_22] : memref<8x128xf32, #tpu.memory_space<vmem>>, vector<8x128xf32>
    tpu.vector_store %arg11[%38, %c0_22], %37 {strides = array<i32>} : memref<8x128xf32, #tpu.memory_space<vmem>>, vector<8x128xf32>,
    %c1_i32 = arith.constant 1 : i32
    %c0_i32_23 = arith.constant 0 : i32
    %40 = arith.cmpi eq, %arg2, %c0_i32_23 : i32
    %41 = arith.extui %40 : i1 to i32
    %c0_i32_24 = arith.constant 0 : i32
    %42 = arith.cmpi ne, %41, %c0_i32_24 : i32
    scf.if %42 {
      %c0_25 = arith.constant 0 : index
      %c0_26 = arith.constant 0 : index
      %43 = vector.load %arg11[%c0_25, %c0_26] : memref<8x128xf32, #tpu.memory_space<vmem>>, vector<8x128xf32>
      %c0_27 = arith.constant 0 : index
      %c0_28 = arith.constant 0 : index
      %c0_29 = arith.constant 0 : index
      %44 = vector.load %arg10[%c0_27, %c0_28, %c0_29] : memref<1x8x128xf32, #tpu.memory_space<vmem>>, vector<1x8x128xf32>
      %45 = vector.shape_cast %44 : vector<1x8x128xf32> to vector<8x128xf32>
      %46 = vector.shape_cast %43 : vector<8x128xf32> to vector<1x8x128xf32>
      tpu.vector_store %arg10[%c0_27, %c0_28, %c0_29], %46 {strides = array<i32>} : memref<1x8x128xf32, #tpu.memory_space<vmem>>, vector<1x8x128xf32>,
    } else {
    }
    return
  }
  func.func @transform_0(%arg0: i32, %arg1: i32, %arg2: i32) -> (i32, i32, i32) {
    %c0_i32 = arith.constant 0 : i32
    %c0_i32_0 = arith.constant 0 : i32
    return %arg0, %arg1, %c0_i32 : i32, i32, i32
  }
  func.func @transform_1(%arg0: i32, %arg1: i32, %arg2: i32) -> (i32, i32, i32) {
    %c0_i32 = arith.constant 0 : i32
    %c0_i32_0 = arith.constant 0 : i32
    return %arg0, %arg2, %c0_i32 : i32, i32, i32
  }
  func.func @transform_2(%arg0: i32, %arg1: i32, %arg2: i32) -> (i32, i32, i32) {
    %c0_i32 = arith.constant 0 : i32
    %c0_i32_0 = arith.constant 0 : i32
    return %arg0, %arg2, %c0_i32 : i32, i32, i32
  }
  func.func @transform_3(%arg0: i32, %arg1: i32, %arg2: i32) -> (i32, i32) {
    %c0_i32 = arith.constant 0 : i32
    %c0_i32_0 = arith.constant 0 : i32
    %c0_i32_1 = arith.constant 0 : i32
    return %c0_i32, %c0_i32_0 : i32, i32
  }
  func.func @transform_4(%arg0: i32, %arg1: i32, %arg2: i32) -> (i32, i32) {
    %c0_i32 = arith.constant 0 : i32
    %c0_i32_0 = arith.constant 0 : i32
    %c0_i32_1 = arith.constant 0 : i32
    return %c0_i32, %c0_i32_0 : i32, i32
  }
  func.func @transform_5(%arg0: i32, %arg1: i32, %arg2: i32) -> (i32, i32) {
    %c0_i32 = arith.constant 0 : i32
    %c0_i32_0 = arith.constant 0 : i32
    %c0_i32_1 = arith.constant 0 : i32
    return %c0_i32, %c0_i32_0 : i32, i32
  }
  func.func @transform_6(%arg0: i32, %arg1: i32, %arg2: i32) -> (i32, i32) {
    %c0_i32 = arith.constant 0 : i32
    %c0_i32_0 = arith.constant 0 : i32
    %c0_i32_1 = arith.constant 0 : i32
    return %c0_i32, %c0_i32_0 : i32, i32
  }
  func.func @transform_7(%arg0: i32, %arg1: i32, %arg2: i32) -> (i32, i32, i32) {
    %c0_i32 = arith.constant 0 : i32
    %c0_i32_0 = arith.constant 0 : i32
    return %arg0, %arg1, %c0_i32 : i32, i32, i32
  }
}

</mosaic_0001>

<bundles_post_ra>
// kernel: tpu_custom_call.1
= control target key start
LH: loop header
LB: loop body
LE: loop exit
PB: predicated region body
PF: predicated region fallthrough
CT: control target
= control target key end

     0   :  { %s2067_s0 = inlined_call_operand.hbm [shape: f32[2,8,128], index: 0, kind: input, shape index: {}]   ;;  %s2068_s1 = inlined_call_operand.hbm [shape: f32[2,8,128], index: 1, kind: input, shape index: {}]   ;;  %s2069_s2 = inlined_call_operand.hbm [shape: f32[2,8,128], index: 2, kind: input, shape index: {}]   ;;  %s2070_s3 = inlined_call_operand.hbm [shape: f32[128,128], index: 3, kind: input, shape index: {}]   ;;  %s2071_s4 = inlined_call_operand.hbm [shape: f32[128,128], index: 4, kind: input, shape index: {}]   ;;  %s2072_s5 = inlined_call_operand.vmem [shape: f32[1,128], index: 5, kind: input, shape index: {}]   ;;  %s2073_s6 = inlined_call_operand.vmem [shape: f32[1,128], index: 6, kind: input, shape index: {}]   ;;  %s2074_s7 = inlined_call_operand.hbm [shape: f32[2,8,128], index: 7, kind: output, shape index: {}]  }
   0x1   :  { %2094 = sst [smem:[#allocation22_spill]] %s2068_s1 }
   0x2   :  { %2095 = sst [smem:[#allocation23_spill]] %s2070_s3 }
   0x3   :  { %2096 = sst [smem:[#allocation24_spill]] %s2071_s4 }
   0x4   :  { %12 = vsyncpa [#allocation4], 0 }
   0x5   :  { %14 = vsyncpa [#allocation4 + $0x1], 0 }
   0x6   :  { %15 = vsyncpa [#allocation7], 0 }
   0x7   :  { %17 = vsyncpa [#allocation7 + $0x1], 0 }
   0x8   :  { %18 = vsyncpa [#allocation10], 0 }
   0x9   :  { %19 = vsyncpa [#allocation5], 0 }
   0xa   :  { %21 = vsyncpa [#allocation5 + $0x1], 0  ;;  %s1701_s24 = smov 0   ;;  %s1703_s25 = smov 0  }
   0xb   :  { %s1705_s26 = smov 0   ;;  %s1707_s27 = smov 0  }
   0xc   :  { %s1709_s28 = smov 0   ;;  %s1711_s29 = smov 0  }
   0xd LB: > { %2097 = sst [smem:[#allocation17_spill]] %s1643_s28  ;;  %s1732_s30 = sadd.s32 4294967295, %s1647_s29   ;;  %s1647_s29 = sphi %s1711_s29, %s27_s29   ;;  %s1643_s28 = sphi %s1709_s28, %s2133_s28   ;;  %s1639_s27 = sphi %s1707_s27, %s2132_s27   ;;  %s1635_s26 = sphi %s1705_s26, %s2136_s26   ;;  %s1631_s25 = sphi %s1703_s25, %s2135_s25   ;;  %s1627_s24 = sphi %s1701_s24, %s2134_s24  }
   0xe   : > { %2098 = sst [smem:[#allocation18_spill]] %s1647_s29  ;;  %s1088_s8 = sadd.s32 4294967294, %s1647_s29  }
   0xf   : > { %p68_p0 = scmp.ne.s32.totalorder %s1631_s25, %s1627_s24  ;;  %p2075_p1 = scmp.eq.s32.totalorder %s1732_s30, 0 }
  0x10   : > { %p240_p3 = scmp.eq.s32.totalorder %s1088_s8, 1  ;;  %p1089_p5 = scmp.ge.s32.totalorder %s1647_s29, 1 }
  0x11   : > { %p1741_p4 = por %p2075_p1, %p68_p0  ;;  %p247_p7 = scmp.lt.s32.totalorder %s1647_s29, 3 }
  0x12   : > { %p1746_p6 = por %p240_p3, %p68_p0  ;;  %s1649_s12 = smov [#allocation9]  }
  0x13   : > { %s2099_s9 = scalar_select %p1741_p4, 1, 0 }
  0x14   : > { %s2100_s10 = scalar_select %p1746_p6, 1, 0 }
  0x15   : > { %p1751_p8 = pnand %p1089_p5, %p247_p7  ;;  %s259_s13 = sshll.u32 %s1649_s12, 4  ;;  %s260_s13 = int_to_ptr.vmem [resolvable:$true] %s259_s13 }
  0x16   : > { %2101 = sst [smem:[#allocation19_spill]] %s2100_s10  ;;  %s46_s15 = sadd.s32 1, %s1643_s28 }
  0x17   : > { %s2102_s11 = scalar_select %p1751_p8, 1, 0 }
  0x18   : > { %p1296_p9 = pneg %p1751_p8  ;;  %s2104_s3 = sld [smem:[#allocation23_spill]] }
  0x1a   : > { %p1760_p11 = pnand %p1296_p9, %p2075_p1 }
  0x1c   : > { %s2103_s14 = scalar_select %p1760_p11, 1, 0 }
  0x1d   : > { %p2086_p13 = pneg %p1760_p11 }
  0x1e   : > { %s1411_s18 = scalar_lea.hbm %s2104_s3, 2048 }
  0x1f   : > { %p1412_p12 = scmp.ne.s32.totalorder %s2104_s3, %s1411_s18  ;;  %p1418_p5 = scmp.lt.u32.totalorder %s1411_s18, %s2104_s3 }
  0x21   : > { %p1414_p0 = pnand %p2086_p13, %p1412_p12 }
  0x23   : > { %p1415_p3 = pneg %p1414_p0 }
  0x25   : > { %p1420_p7 = pnand %p1418_p5, %p1415_p3 }
  0x27   : > { %1423 = shalt.err (!%p1420_p7)
}
  0x28   : > { %s1424_s23 = scalar_lea.vmem %s260_s13, 2048  ;;  %p1432_p2 = scmp.lt.s32.totalorder %s260_s13, %s260_s13 }
  0x29   : > { %p1425_p9 = scmp.ne.s32.totalorder %s260_s13, %s1424_s23  ;;  %p1433_p6 = scmp.lt.s32.totalorder %s1424_s23, %s1424_s23 }
  0x2b   : > { %p1427_p10 = pnand %p1425_p9, %p2086_p13  ;;  %p1434_p4 = por %p1433_p6, %p1432_p2 }
  0x2d   : > { %p1428_p1 = pneg %p1427_p10 }
  0x2f   : > { %p1435_p8 = pnand %p1434_p4, %p1428_p1 }
  0x31   : > { %1438 = shalt.err (!%p1435_p8)
}
  0x32   : > { %s2078_s8 = smov 128   ;;  %s2079_s12 = smov 8  }
  0x33   : > { %1299 = dma.hbm_to_vmem [thread:$0]  (!%p1760_p11), %s2104_s3, 2048, %s260_s13, [#allocation10], %s2078_s8, %s2078_s8, %s2079_s12  }
  0x34   : > { %p48_p1 = scmp.ge.s32.totalorder %s46_s15, 2  ;;  %s55_s18 = sadd.s32 1, %s1635_s26 }
  0x35   : > { %p62_p2 = scmp.ne.s32.totalorder %s1635_s26, %s1631_s25  ;;  %p63_p4 = scmp.eq.s32.totalorder %s1647_s29, 0 }
  0x36   : > { %s2138_s15 = smov (%p48_p1, %s46_s15), 0  ;;  %p2106_p8 = scmp.eq.s32.totalorder %s1732_s30, 1 }
  0x37   : > { %2105 = sst [smem:[#allocation20_spill]] %s2138_s15  ;;  %p64_p6 = por %p63_p4, %p62_p2 }
  0x38   : > { %p1798_p10 = por %p2106_p8, %p62_p2  ;;  %s50_s20 = ssub.s32 %s1643_s28, %s2138_s15 }
  0x39   : > { %p1319_p12 = scmp.lt.s32.totalorder %s1647_s29, 2  ;;  %p53_p0 = scmp.eq.s32.totalorder %s50_s20, 0 }
  0x3a   : > { %s2107_s19 = scalar_select %p1798_p10, 1, 0 }
  0x3b   : > { %s2080_s21 = sand.u32 1, %s1635_s26   ;;  %s1811_s22 = sshll.u32 %s1643_s28, 7 }
  0x3c   : > { %s1808_s13 = sshll.u32 %s2080_s21, 3  ;;  %p1816_p3 = pnand %p1319_p12, %p64_p6 }
  0x3d   : > { %s1814_s23 = scalar_select %p53_p0, %s1635_s26, %s55_s18  }
  0x3e   : > { %s2109_s16 = scalar_select %p1816_p3, 1, 0 }
  0x3f   : > { %2108 = sst [smem:[#allocation21_spill]] %s1814_s23  ;;  %s311_s17 = sand.u32 1, %s1647_s29  }
  0x40   : > { %s2110_s1 = sld [smem:[#allocation22_spill]]  ;;  %s315_s21 = scalar_lea.vmem [#allocation6], %s1808_s13 }
  0x41   : > { %s323_s3 = sshll.u32 %s315_s21, 4  ;;  %s1652_s18 = smov [#allocation11]   ;;  %s1828_s3 = int_to_ptr.vmem [resolvable:$true] %s323_s3 }
  0x42   : > { %s1830_s15 = sshll.u32 %s1652_s18, 4  ;;  %s1832_s28 = scalar_lea.sflag [#allocation7], %s311_s17  ;;  %s273_s15 = int_to_ptr.vmem [resolvable:$true] %s1830_s15 }
  0x43   : > { %p1838_p7 = pneg %p1816_p3 }
  0x45   : > { %s2111_s8 = scalar_select %p1838_p7, 1, 0 }
  0x46   : > { %s1825_s20 = scalar_lea.hbm %s2110_s1, %s1811_s22  ;;  %s1444_s29 = scalar_lea.hbm %s2110_s1, 256 }
  0x47   : > { %s1439_s23 = scalar_lea.hbm %s1825_s20, 128  ;;  %p1445_p2 = scmp.lt.u32.totalorder %s1825_s20, %s2110_s1 }
  0x48   : > { %p1440_p5 = scmp.ne.s32.totalorder %s1825_s20, %s1439_s23  ;;  %p1446_p4 = scmp.lt.u32.totalorder %s1444_s29, %s1439_s23 }
  0x49   : > { %p1448_p8 = scmp.lt.u32.totalorder %s1439_s23, %s1825_s20 }
  0x4a   : > { %p1442_p9 = pnand %p1838_p7, %p1440_p5  ;;  %p1447_p6 = por %p1446_p4, %p1445_p2 }
  0x4c   : > { %p1443_p1 = pneg %p1442_p9  ;;  %p1449_p12 = por %p1448_p8, %p1447_p6 }
  0x4e   : > { %p1450_p0 = pnand %p1449_p12, %p1443_p1 }
  0x50   : > { %1453 = shalt.err (!%p1450_p0)
}
  0x51   : > { %s1454_s17 = scalar_lea.vmem %s1828_s3, 128  ;;  %s1653_s12 = smov [#allocation6]  }
  0x52   : > { %p1455_p5 = scmp.ne.s32.totalorder %s1828_s3, %s1454_s17  ;;  %s1459_s21 = sshll.u32 %s1653_s12, 4  ;;  %s1460_s21 = int_to_ptr.vmem [resolvable:$false] %s1459_s21 }
  0x53   : > { %s1461_s10 = scalar_lea.vmem %s1460_s21, 256  ;;  %p1462_p10 = scmp.lt.s32.totalorder %s1828_s3, %s1460_s21 }
  0x54   : > { %p1457_p9 = pnand %p1455_p5, %p1838_p7  ;;  %p1463_p11 = scmp.lt.s32.totalorder %s1461_s10, %s1454_s17 }
  0x56   : > { %p1458_p13 = pneg %p1457_p9  ;;  %p1464_p2 = por %p1463_p11, %p1462_p10 }
  0x58   : > { %p1465_p4 = pnand %p1464_p2, %p1458_p13 }
  0x5a   : > { %1468 = shalt.err (!%p1465_p4)
}
  0x5b   : > { %1309 = dma.hbm_to_vmem [thread:$0]  (!%p1816_p3), %s1825_s20, 128, %s1828_s3, %s1832_s28  }
  0x5c   : > { %s2112_s4 = sld [smem:[#allocation24_spill]]  ;;  %p2113_p11 = scmp.ne.s32.totalorder %s2103_s14, 0 }
  0x5e   : > { %p2114_p13 = pneg %p2113_p11 }
  0x62   : > { %s1469_s18 = scalar_lea.hbm %s2112_s4, 2048 }
  0x63   : > { %p1470_p1 = scmp.ne.s32.totalorder %s2112_s4, %s1469_s18  ;;  %p1476_p8 = scmp.lt.u32.totalorder %s1469_s18, %s2112_s4 }
  0x65   : > { %p1472_p10 = pnand %p1470_p1, %p2114_p13 }
  0x67   : > { %p1473_p6 = pneg %p1472_p10 }
  0x69   : > { %p1478_p12 = pnand %p1476_p8, %p1473_p6 }
  0x6b   : > { %1481 = shalt.err (!%p1478_p12)
}
  0x6c   : > { %s1482_s3 = scalar_lea.vmem %s273_s15, 2048  ;;  %p2115_p5 = pmov %p2114_p13 }
  0x6d   : > { %p1483_p0 = scmp.ne.s32.totalorder %s273_s15, %s1482_s3  ;;  %p1490_p4 = scmp.lt.s32.totalorder %s273_s15, %s273_s15 }
  0x6e   : > { %p1491_p3 = scmp.lt.s32.totalorder %s1482_s3, %s1482_s3 }
  0x6f   : > { %p1485_p9 = pnand %p1483_p0, %p2115_p5 }
  0x70   : > { %p1492_p7 = por %p1491_p3, %p1490_p4 }
  0x71   : > { %p1486_p2 = pneg %p1485_p9 }
  0x73   : > { %p1493_p1 = pnand %p1492_p7, %p1486_p2 }
  0x75   : > { %1496 = shalt.err (!%p1493_p1)
}
  0x76   : > { %s2116_s1 = smov 8   ;;  %s2117_s20 = smov 128  }
  0x77   : > { %1302 = dma.hbm_to_vmem [thread:$0]  (!%p2113_p11), %s2112_s4, 2048, %s273_s15, [#allocation10], %s2117_s20, %s2117_s20, %s2116_s1  }
  0x78   : > { %s1890_s12 = scalar_lea.hbm %s2067_s0, %s1811_s22  ;;  %s296_s14 = scalar_lea.vmem [#allocation3], %s1808_s13 }
  0x79   : > { %s304_s17 = sshll.u32 %s296_s14, 4  ;;  %s1899_s10 = scalar_lea.hbm %s2069_s2, %s1811_s22  ;;  %s1893_s17 = int_to_ptr.vmem [resolvable:$true] %s304_s17 }
  0x7a   : > { %s2118_s29 = sand.u32 1, %s1635_s26   ;;  %s1497_s1 = scalar_lea.hbm %s1890_s12, 128 }
  0x7b   : > { %s293_s15 = scalar_lea.sflag [#allocation4], %s2118_s29  ;;  %p1498_p3 = scmp.ne.s32.totalorder %s1890_s12, %s1497_s1 }
  0x7c   : > { %p2119_p7 = scmp.ne.s32.totalorder %s2111_s8, 0  ;;  %s1502_s18 = scalar_lea.hbm %s2067_s0, 256 }
  0x7d   : > { %p1503_p10 = scmp.lt.u32.totalorder %s1890_s12, %s2067_s0  ;;  %p1504_p6 = scmp.lt.u32.totalorder %s1502_s18, %s1497_s1 }
  0x7e   : > { %p1500_p11 = pnand %p1498_p3, %p2119_p7  ;;  %p1506_p12 = scmp.lt.u32.totalorder %s1497_s1, %s1890_s12 }
  0x7f   : > { %p1505_p8 = por %p1504_p6, %p1503_p10 }
  0x80   : > { %p1501_p13 = pneg %p1500_p11 }
  0x81   : > { %p1507_p0 = por %p1506_p12, %p1505_p8 }
  0x83   : > { %p1508_p5 = pnand %p1507_p0, %p1501_p13 }
  0x85   : > { %1511 = shalt.err (!%p1508_p5)
}
  0x86   : > { %s1512_s22 = scalar_lea.vmem %s1893_s17, 128  ;;  %s1654_s21 = smov [#allocation3]  }
  0x87   : > { %p1513_p9 = scmp.ne.s32.totalorder %s1893_s17, %s1512_s22  ;;  %s1517_s3 = sshll.u32 %s1654_s21, 4  ;;  %s1518_s3 = int_to_ptr.vmem [resolvable:$false] %s1517_s3 }
  0x88   : > { %s1519_s4 = scalar_lea.vmem %s1518_s3, 256  ;;  %p1520_p1 = scmp.lt.s32.totalorder %s1893_s17, %s1518_s3 }
  0x89   : > { %p1515_p2 = pnand %p1513_p9, %p2119_p7  ;;  %p1521_p3 = scmp.lt.s32.totalorder %s1519_s4, %s1512_s22 }
  0x8b   : > { %p1516_p4 = pneg %p1515_p2  ;;  %p1522_p11 = por %p1521_p3, %p1520_p1 }
  0x8d   : > { %p1523_p10 = pnand %p1522_p11, %p1516_p4 }
  0x8f   : > { %1526 = shalt.err (!%p1523_p10)
}
  0x90   : > { %p2120_p13 = scmp.ne.s32.totalorder %s2109_s16, 0  ;;  %s334_s29 = scalar_lea.vmem [#allocation8], %s1808_s13 }
  0x91   : > { %s342_s1 = sshll.u32 %s334_s29, 4  ;;  %s1527_s20 = scalar_lea.hbm %s1899_s10, 128  ;;  %s343_s1 = int_to_ptr.vmem [resolvable:$true] %s342_s1 }
  0x92   : > { %1306 = dma.hbm_to_vmem [thread:$0]  (!%p2120_p13), %s1890_s12, 128, %s1893_s17, %s293_s15  }
  0x93   : > { %p1528_p6 = scmp.ne.s32.totalorder %s1899_s10, %s1527_s20  ;;  %s1532_s14 = scalar_lea.hbm %s2069_s2, 256 }
  0x94   : > { %p1533_p0 = scmp.lt.u32.totalorder %s1899_s10, %s2069_s2  ;;  %p1534_p5 = scmp.lt.u32.totalorder %s1532_s14, %s1527_s20 }
  0x95   : > { %p1530_p8 = pnand %p1528_p6, %p2119_p7  ;;  %p1536_p2 = scmp.lt.u32.totalorder %s1527_s20, %s1899_s10 }
  0x96   : > { %p1535_p9 = por %p1534_p5, %p1533_p0 }
  0x97   : > { %p1531_p12 = pneg %p1530_p8 }
  0x98   : > { %p1537_p4 = por %p1536_p2, %p1535_p9 }
  0x9a   : > { %p1538_p1 = pnand %p1537_p4, %p1531_p12 }
  0x9c   : > { %1541 = shalt.err (!%p1538_p1)
}
  0x9d   : > { %s1542_s13 = scalar_lea.vmem %s343_s1, 128  ;;  %s1655_s12 = smov [#allocation8]  }
  0x9e   : > { %p1543_p3 = scmp.ne.s32.totalorder %s343_s1, %s1542_s13  ;;  %s1547_s17 = sshll.u32 %s1655_s12, 4  ;;  %s1548_s17 = int_to_ptr.vmem [resolvable:$false] %s1547_s17 }
  0x9f   : > { %s1549_s15 = scalar_lea.vmem %s1548_s17, 256  ;;  %p1550_p6 = scmp.lt.s32.totalorder %s343_s1, %s1548_s17 }
  0xa0   : > { %p1545_p11 = pnand %p1543_p3, %p2119_p7  ;;  %p1551_p8 = scmp.lt.s32.totalorder %s1549_s15, %s1542_s13 }
  0xa2   : > { %p1546_p10 = pneg %p1545_p11  ;;  %p1552_p13 = por %p1551_p8, %p1550_p6 }
  0xa4   : > { %p1553_p0 = pnand %p1552_p13, %p1546_p10 }
  0xa6   : > { %1556 = shalt.err (!%p1553_p0)
}
  0xa7   : > { %p2121_p5 = scmp.ne.s32.totalorder %s2109_s16, 0  ;;  %p2122_p12 = scmp.ne.s32.totalorder %s2102_s11, 0 }
  0xa8   : > { %s1946_s8 = sand.u32 (!%p2122_p12), 1, %s1631_s25   ;;  %p2123_p7 = scmp.ne.s32.totalorder (!%p2122_p12), %s2099_s9, 0 }
  0xa9   : > { %1312 = dma.hbm_to_vmem [thread:$0]  (!%p2121_p5), %s1899_s10, 128, %s343_s1, %s1832_s28  }
  0xaa   : > { %351 = sbr.rel (%p2122_p12) target bundleno = 854 (0x356), region = 48  ;;  %s1949_s3 = sshll.u32 (!%p2122_p12), %s1946_s8, 3 }
  0xab   : > { %s354_s4 = scalar_lea.sflag (!%p2122_p12), [#allocation4], %s1946_s8  ;;  %s357_s29 = scalar_lea.vmem (!%p2122_p12), [#allocation3], %s1949_s3 }
  0xb1   : > { %1610 = dma.done.wait (%p2123_p7), %s354_s4, 128  }
  0xb2   : > { %1612 = vsyncadd (%p2123_p7), %s354_s4, 4294967168  ;;  %s362_s28 = sand.u32 1, %s1732_s30   ;;  %s366_s16 = scalar_lea.vmem [#allocation6], %s1949_s3 }
  0xb3   : > { %s363_s11 = scalar_lea.sflag [#allocation7], %s362_s28 }
  0xb4   : > { %1614 = dma.done.wait (%p2123_p7), %s363_s11, 256  }
  0xb5   : > { %1616 = vsyncadd (%p2123_p7), %s363_s11, 4294967040  ;;  %s375_s10 = scalar_lea.vmem [#allocation8], %s1949_s3  ;;  %p2124_p13 = scmp.eq.s32.totalorder %s1732_s30, 0 }
  0xb7   : > { %1618 = dma.done.wait (%p2124_p13), [#allocation10], 4096   ;;  %p2125_p9 = pmov %p2124_p13 }
  0xb8   : > { %v1656_v0 = vmov 0.0|0.0   ;;  %vm1657_vm0 = vmmov 0   ;;  %v1658_v1 = vmov 0.0   ;;  %v520_v2 = vld [vmem:[#allocation9] sm:$0xff]  ;;  %v521_v3 = vld [vmem:[#allocation9 + $0x8] sm:$0xff]  ;;  %v522_v4 = vld [vmem:[#allocation9 + $0x10] sm:$0xff]  ;;  %v617_v52 = vlaneseq }
  0xb9   : > { %1620 = vsyncadd (%p2125_p9), [#allocation10], 4294963200  ;;  %1256 = vmatprep.subr.bf16.mxu1 %v1656_v0  ;;  %1232 = vmatprep.subr.bf16.mxu0 %v1656_v0  ;;  %v1257_v5 = vpack.c.bf16 %v521_v3, %v520_v2  ;;  %v523_v6 = vld [vmem:[#allocation9 + $0x18] sm:$0xff]  ;;  %v431_v7 = vld [vmem:[#allocation11] sm:$0xff]  ;;  %v1659_v56 = vmov 1966171168  }
  0xba   : > { %1224 = vmatprep.mubr.msk.f32.mxu1 %vm1657_vm0, %v1658_v1  ;;  %1189 = vmatprep.mubr.msk.f32.mxu0 %vm1657_vm0, %v1658_v1  ;;  %v432_v8 = vld [vmem:[#allocation11 + $0x8] sm:$0xff]  ;;  %v433_v10 = vld [vmem:[#allocation11 + $0x10] sm:$0xff]  ;;  %v1260_v11 = vpack.c.bf16 %v523_v6, %v522_v4  ;;  %v434_v12 = vld [vmem:[#allocation11 + $0x18] sm:$0xff]  ;;  %v618_v53 = vshrl.u32 %v617_v52, 7  ;;  %v798_v54 = vand.u32 127, %v617_v52  ;;  %v615_v57 = vunpack.c.l.s4 %v1659_v56  ;;  %s423_s23 = scalar_lea.vmem [#allocation12], %s1949_s3 }
  0xbb   : > { %v1233_v9 = vpack.c.bf16 %v432_v8, %v431_v7  ;;  %1258 = vmatpush3.bf16.msra.mxu1 %v1257_v5  ;;  %v524_v13 = vld [vmem:[#allocation9 + $0x20] sm:$0xff]  ;;  %v525_v14 = vld [vmem:[#allocation9 + $0x28] sm:$0xff]  ;;  %v1236_v15 = vpack.c.bf16 %v434_v12, %v433_v10  ;;  %v526_v19 = vld [vmem:[#allocation9 + $0x30] sm:$0xff]  ;;  %vm831_vm1 = vcmask 1041409   ;;  %vm833_vm2 = vcmask 1042434   ;;  %s940_s18 = sshll.u32 %s423_s23, 4  ;;  %s2015_s18 = int_to_ptr.vmem [resolvable:$true] %s940_s18 }
  0xbc   : > { %1259 = vmatprep.subr.bf16.mxu1 %v1656_v0  ;;  %v435_v16 = vld [vmem:[#allocation11 + $0x20] sm:$0xff]  ;;  %v436_v17 = vld [vmem:[#allocation11 + $0x28] sm:$0xff]  ;;  %v1263_v18 = vpack.c.bf16 %v525_v14, %v524_v13  ;;  %v527_v20 = vld [vmem:[#allocation9 + $0x38] sm:$0xff]  ;;  %v1995_v55 = vsub.s32 %v798_v54, %v618_v53  ;;  %v616_v58 = vunpack.c.0.s8 %v615_v57  ;;  %v664_v4 = vsub.s32 0, %v618_v53  ;;  %s1118_s14 = sshll.u32 %s1639_s27, 7  ;;  %s926_s12 = scalar_lea.sflag [#allocation5], %s1946_s8 }
  0xbd   : > { %1234 = vmatpush3.bf16.msra.mxu0 %v1233_v9  ;;  %v1239_v21 = vpack.c.bf16 %v436_v17, %v435_v16  ;;  %v437_v22 = vld [vmem:[#allocation11 + $0x30] sm:$0xff]  ;;  %v438_v23 = vld [vmem:[#allocation11 + $0x38] sm:$0xff]  ;;  %v1266_v24 = vpack.c.bf16 %v527_v20, %v526_v19  ;;  %v528_v25 = vld [vmem:[#allocation9 + $0x40] sm:$0xff]  ;;  %vm835_vm3 = vcmask 1043459   ;;  %vm837_vm4 = vcmask 1044484   ;;  %s2020_s13 = scalar_lea.hbm %s2074_s7, %s1118_s14  ;;  %s1557_s17 = scalar_lea.vmem %s2015_s18, 128 }
  0xbe   : > { %1235 = vmatprep.subr.bf16.mxu0 %v1656_v0  ;;  %v529_v26 = vld [vmem:[#allocation9 + $0x48] sm:$0xff]  ;;  %v1242_v27 = vpack.c.bf16 %v438_v23, %v437_v22  ;;  %v439_v28 = vld [vmem:[#allocation11 + $0x40] sm:$0xff]  ;;  %v530_v31 = vld [vmem:[#allocation9 + $0x50] sm:$0xff]  ;;  %v619_v60 = vsub.s32 %v616_v58, %v618_v53  ;;  %vm839_vm5 = vcmask 1045509   ;;  %vm841_vm6 = vcmask 1046534   ;;  %p1558_p2 = scmp.ne.s32.totalorder %s2015_s18, %s1557_s17  ;;  %p2126_p4 = scmp.ne.s32.totalorder %s2107_s19, 0 }
  0xbf   : > { %1261 = vmatpush3.bf16.msra.mxu1 %v1260_v11  ;;  %v440_v29 = vld [vmem:[#allocation11 + $0x48] sm:$0xff]  ;;  %v1269_v30 = vpack.c.bf16 %v529_v26, %v528_v25  ;;  %v531_v32 = vld [vmem:[#allocation9 + $0x58] sm:$0xff]  ;;  %v441_v34 = vld [vmem:[#allocation11 + $0x50] sm:$0xff]  ;;  %vm843_vm7 = vcmask 1047559   ;;  %vm845_vm8 = vcmask 64512   ;;  %s1660_s27 = smov [#allocation12]  }
  0xc0   : > { %1262 = vmatprep.subr.bf16.mxu1 %v1656_v0  ;;  %v1245_v33 = vpack.c.bf16 %v440_v29, %v439_v28  ;;  %v442_v35 = vld [vmem:[#allocation11 + $0x58] sm:$0xff]  ;;  %v1272_v36 = vpack.c.bf16 %v531_v32, %v530_v31  ;;  %v532_v37 = vld [vmem:[#allocation9 + $0x60] sm:$0xff]  ;;  %v533_v38 = vld [vmem:[#allocation9 + $0x68] sm:$0xff]  ;;  %p1559_p1 = pnand %p1558_p2, %p2126_p4  ;;  %s1561_s15 = sshll.u32 %s1660_s27, 4  ;;  %s1562_s15 = int_to_ptr.vmem [resolvable:$false] %s1561_s15 }
  0xc1   : > { %1237 = vmatpush3.bf16.msra.mxu0 %v1236_v15  ;;  %v1248_v39 = vpack.c.bf16 %v442_v35, %v441_v34  ;;  %v443_v40 = vld [vmem:[#allocation11 + $0x60] sm:$0xff]  ;;  %v444_v41 = vld [vmem:[#allocation11 + $0x68] sm:$0xff]  ;;  %v1275_v42 = vpack.c.bf16 %v533_v38, %v532_v37  ;;  %v534_v43 = vld [vmem:[#allocation9 + $0x70] sm:$0xff]  ;;  %s1563_s3 = scalar_lea.vmem %s1562_s15, 256  ;;  %p1564_p11 = scmp.lt.s32.totalorder %s2015_s18, %s1562_s15 }
  0xc2   : > { %1238 = vmatprep.subr.bf16.mxu0 %v1656_v0  ;;  %v535_v44 = vld [vmem:[#allocation9 + $0x78] sm:$0xff]  ;;  %v1251_v45 = vpack.c.bf16 %v444_v41, %v443_v40  ;;  %v445_v46 = vld [vmem:[#allocation11 + $0x70] sm:$0xff]  ;;  %v429_v51 = vld [vmem:[%s366_s16] sm:$0xff]  ;;  %p1560_p3 = pneg %p1559_p1  ;;  %p1565_p10 = scmp.lt.s32.totalorder %s1563_s3, %s1557_s17 }
  0xc3   : > { %1264 = vmatpush3.bf16.msra.mxu1 %v1263_v18  ;;  %v446_v47 = vld [vmem:[#allocation11 + $0x78] sm:$0xff]  ;;  %v1278_v48 = vpack.c.bf16 %v535_v44, %v534_v43  ;;  %v1106_v59 = vld [vmem:[%s2072_s5] ss:$0 sm:$0xff] }
  0xc4   : > { %1265 = vmatprep.subr.bf16.mxu1 %v1656_v0  ;;  %v1254_v49 = vpack.c.bf16 %v446_v47, %v445_v46  ;;  %v519_v50 = vld [vmem:[%s357_s29] sm:$0xff]  ;;  %p1566_p6 = por %p1565_p10, %p1564_p11 }
  0xc5   : > { %1240 = vmatpush3.bf16.msra.mxu0 %v1239_v21  ;;  %v1115_v56 = vld [vmem:[%s2073_s6] ss:$0 sm:$0xff] }
  0xc6   : > { %1241 = vmatprep.subr.bf16.mxu0 %v1656_v0  ;;  %p1567_p8 = pnand %p1566_p6, %p1560_p3 }
  0xc7   : > { %1267 = vmatpush3.bf16.msra.mxu1 %v1266_v24 }
  0xc8   : > { %1268 = vmatprep.subr.bf16.mxu1 %v1656_v0 }
  0xc9   : > { %1243 = vmatpush3.bf16.msra.mxu0 %v1242_v27 }
  0xca   : > { %1244 = vmatprep.subr.bf16.mxu0 %v1656_v0 }
  0xcb   : > { %1270 = vmatpush3.bf16.msra.mxu1 %v1269_v30 }
  0xcc   : > { %1271 = vmatprep.subr.bf16.mxu1 %v1656_v0 }
  0xcd   : > { %1246 = vmatpush3.bf16.msra.mxu0 %v1245_v33 }
  0xce   : > { %1247 = vmatprep.subr.bf16.mxu0 %v1656_v0 }
  0xcf   : > { %1273 = vmatpush3.bf16.msra.mxu1 %v1272_v36 }
  0xd0   : > { %1274 = vmatprep.subr.bf16.mxu1 %v1656_v0 }
  0xd1   : > { %1249 = vmatpush3.bf16.msra.mxu0 %v1248_v39 }
  0xd2   : > { %1250 = vmatprep.subr.bf16.mxu0 %v1656_v0 }
  0xd3   : > { %1276 = vmatpush3.bf16.msra.mxu1 %v1275_v42 }
  0xd4   : > { %1277 = vmatprep.subr.bf16.mxu1 %v1656_v0 }
  0xd5   : > { %1252 = vmatpush3.bf16.msra.mxu0 %v1251_v45 }
  0xd6   : > { %1253 = vmatprep.subr.bf16.mxu0 %v1656_v0 }
  0xd7   : > { %1279 = vmatpush3.bf16.msra.mxu1 %v1278_v48 }
  0xd9   : > { %1255 = vmatpush3.bf16.msra.mxu0 %v1254_v49 }
  0xda   : > { %1227 = vmatprep.subr.mxu0 %v1658_v1  ;;  %1225 = vmatmul.mubr.f32.vlgmr.msra.gmra.mrb[0].mxu1 %v519_v50 }
  0xdc   : > { %1190 = vmatmul.mubr.f32.vlgmr.msra.gmra.mrb[0].mxu0 %v429_v51 }
  0xdd   : > { %1229 = vmatprep.mubr.msk.f32.mxu0 %vm1657_vm0, %v1658_v1 }
 0x1ad   : > { %v608_v61 = vpop.f32.mrb[0].mxu1 }
 0x1ae   : > { %v609_v62 = vadd.f32 %v1106_v59, %v608_v61  ;;  %v1226_v63 = vpop.f32.mrb[1].mxu1 }
 0x1af   : > { %v513_v0 = vpop.f32.mrb[0].mxu0 }
 0x1b0   : > { %v1191_v2 = vpop.f32.mrb[1].mxu0  ;;  %v613_v3 = vcombine.high %v609_v62, %v609_v62  ;;  %v620_v1 = vrot.slane %v609_v62, %v619_v60 }
 0x1b2   : > { %v627_v5 = vrot.slane %v613_v3, %v619_v60  ;;  %v628_v6 = vcombine.high %v620_v1, %v620_v1  ;;  %v636_v7 = vrot.slane %v620_v1, %v619_v60 }
 0x1b4   : > { %v629_v8 = vcombine.high %v627_v5, %v627_v5  ;;  %v643_v9 = vrot.slane %v627_v5, %v619_v60  ;;  %v650_v10 = vrot.slane %v628_v6, %v619_v60  ;;  %v658_v11 = vcombine.high %v636_v7, %v636_v7 }
 0x1b5   : > { %v665_v12 = vrot.slane %v636_v7, %v664_v4 }
 0x1b6   : > { %v657_v13 = vrot.slane %v629_v8, %v619_v60  ;;  %v659_v14 = vcombine.high %v643_v9, %v643_v9  ;;  %v660_v15 = vcombine.high %v650_v10, %v650_v10  ;;  %v669_v16 = vrot.slane %v650_v10, %v664_v4  ;;  %v430_v10 = vld [vmem:[%s375_s10] sm:$0xff] }
 0x1b7   : > { %v673_v17 = vrot.slane %v658_v11, %v664_v4  ;;  %v681_v18 = vrot.slane %v643_v9, %v664_v4  ;;  %v702_v19 = vadd.f32 %v665_v12, %v513_v0  ;;  %1228 = vmatpush3.msra.mxu0 %v430_v10 }
 0x1b8   : > { %v661_v20 = vcombine.high %v657_v13, %v657_v13  ;;  %v677_v21 = vrot.slane %v660_v15, %v664_v4  ;;  %v685_v22 = vrot.slane %v657_v13, %v664_v4  ;;  %v689_v23 = vrot.slane %v659_v14, %v664_v4 }
 0x1b9   : > { %v1107_v24 = vmul.f32 -1.442695, %v702_v19  ;;  %v704_v25 = vadd.f32 %v673_v17, %v513_v0  ;;  %v703_v26 = vadd.f32 %v669_v16, %v513_v0  ;;  %v706_v27 = vadd.f32 %v681_v18, %v513_v0 }
 0x1ba   : > { %v693_v28 = vrot.slane %v661_v20, %v664_v4  ;;  %v705_v29 = vadd.f32 %v677_v21, %v513_v0  ;;  %v707_v30 = vadd.f32 %v685_v22, %v513_v0  ;;  %v708_v31 = vadd.f32 %v689_v23, %v513_v0 }
 0x1bb   : > { %1379 = vpow2.f32 %v1107_v24  ;;  %v1109_v32 = vmul.f32 -1.442695, %v704_v25  ;;  %v1108_v33 = vmul.f32 -1.442695, %v703_v26  ;;  %v1111_v35 = vmul.f32 -1.442695, %v706_v27 }
 0x1bc   : > { %v1110_v34 = vmul.f32 -1.442695, %v705_v29  ;;  %v709_v36 = vadd.f32 %v693_v28, %v513_v0  ;;  %v1112_v37 = vmul.f32 -1.442695, %v707_v30  ;;  %v1113_v38 = vmul.f32 -1.442695, %v708_v31 }
 0x1bd   : > { %1381 = vpow2.f32 %v1109_v32 }
 0x1be   : > { %1383 = vpow2.f32 %v1108_v33  ;;  %v1114_v39 = vmul.f32 -1.442695, %v709_v36 }
 0x1bf   : > { %1385 = vpow2.f32 %v1110_v34 }
 0x1c0   : > { %1387 = vpow2.f32 %v1111_v35 }
 0x1c1   : > { %1389 = vpow2.f32 %v1112_v37 }
 0x1c2   : > { %1391 = vpow2.f32 %v1113_v38 }
 0x1c3   : > { %1393 = vpow2.f32 %v1114_v39 }
 0x1c5   : > { %v1380_v40 = vpop.eup %1379 }
 0x1c6   : > { %v734_v41 = vadd.f32 1.0, %v1380_v40 }
 0x1c7   : > { %v1382_v42 = vpop.eup %1381 }
 0x1c8   : > { %v1384_v43 = vpop.eup %1383  ;;  %1395 = vrcp.f32 %v734_v41  ;;  %v736_v44 = vadd.f32 1.0, %v1382_v42 }
 0x1c9   : > { %v1386_v45 = vpop.eup %1385  ;;  %v735_v46 = vadd.f32 1.0, %v1384_v43 }
 0x1ca   : > { %v1388_v47 = vpop.eup %1387  ;;  %1397 = vrcp.f32 %v736_v44  ;;  %v737_v48 = vadd.f32 1.0, %v1386_v45 }
 0x1cb   : > { %v1390_v49 = vpop.eup %1389  ;;  %1399 = vrcp.f32 %v735_v46  ;;  %v738_v50 = vadd.f32 1.0, %v1388_v47 }
 0x1cc   : > { %v1392_v51 = vpop.eup %1391  ;;  %1401 = vrcp.f32 %v737_v48  ;;  %v739_v52 = vadd.f32 1.0, %v1390_v49 }
 0x1cd   : > { %v1394_v53 = vpop.eup %1393  ;;  %1403 = vrcp.f32 %v738_v50  ;;  %v740_v54 = vadd.f32 1.0, %v1392_v51 }
 0x1ce   : > { %1405 = vrcp.f32 %v739_v52  ;;  %v741_v57 = vadd.f32 1.0, %v1394_v53 }
 0x1cf   : > { %1407 = vrcp.f32 %v740_v54 }
 0x1d0   : > { %1409 = vrcp.f32 %v741_v57 }
 0x1d2   : > { %v1396_v58 = vpop.eup %1395 }
 0x1d3   : > { %v764_v59 = vmul.f32 %v1396_v58, %v1115_v56 }
 0x1d4   : > { %v1398_v60 = vpop.eup %1397 }
 0x1d5   : > { %v1400_v61 = vpop.eup %1399  ;;  %772 = vadd.xlane.f32.xlu0 %v764_v59  ;;  %v766_v62 = vmul.f32 %v1398_v60, %v1115_v56 }
 0x1d6   : > { %v1402_v63 = vpop.eup %1401  ;;  %v765_v0 = vmul.f32 %v1400_v61, %v1115_v56 }
 0x1d7   : > { %776 = vadd.xlane.f32.xlu1 %v766_v62  ;;  %v1404_v2 = vpop.eup %1403  ;;  %v767_v3 = vmul.f32 %v1402_v63, %v1115_v56 }
 0x1d8   : > { %v1406_v1 = vpop.eup %1405  ;;  %v768_v4 = vmul.f32 %v1404_v2, %v1115_v56 }
 0x1d9   : > { %774 = vadd.xlane.f32.xlu0 %v765_v0  ;;  %v1408_v5 = vpop.eup %1407  ;;  %v769_v6 = vmul.f32 %v1406_v1, %v1115_v56 }
 0x1da   : > { %v1410_v7 = vpop.eup %1409  ;;  %v770_v8 = vmul.f32 %v1408_v5, %v1115_v56 }
 0x1db   : > { %778 = vadd.xlane.f32.xlu1 %v767_v3  ;;  %v771_v9 = vmul.f32 %v1410_v7, %v1115_v56 }
 0x1dd   : > { %780 = vadd.xlane.f32.xlu0 %v768_v4 }
 0x1df   : > { %782 = vadd.xlane.f32.xlu1 %v769_v6 }
 0x1e1   : > { %784 = vadd.xlane.f32.xlu0 %v770_v8 }
 0x1e3   : > { %786 = vadd.xlane.f32.xlu1 %v771_v9 }
 0x262   : > { %v773_v11 = vpop.xlane.xlu0 %772 }
 0x263   : > { %v802_v14 = vrot.slane %v773_v11, %v1995_v55 }
 0x264   : > { %v777_v12 = vpop.xlane.xlu1 %776 }
 0x265   : > { %v810_v16 = vrot.slane %v777_v12, %v1995_v55 }
 0x266   : > { %v775_v13 = vpop.xlane.xlu0 %774 }
 0x267   : > { %v806_v15 = vrot.slane %v775_v13, %v1995_v55 }
 0x268   : > { %v779_v17 = vpop.xlane.xlu1 %778 }
 0x269   : > { %v832_v18 = vsel %vm831_vm1, %v806_v15, %v802_v14  ;;  %v814_v19 = vrot.slane %v779_v17, %v1995_v55 }
 0x26a   : > { %v834_v20 = vsel %vm833_vm2, %v810_v16, %v832_v18  ;;  %v781_v21 = vpop.xlane.xlu0 %780 }
 0x26b   : > { %v836_v22 = vsel %vm835_vm3, %v814_v19, %v834_v20  ;;  %v818_v23 = vrot.slane %v781_v21, %v1995_v55 }
 0x26c   : > { %v783_v24 = vpop.xlane.xlu1 %782 }
 0x26d   : > { %v838_v25 = vsel %vm837_vm4, %v818_v23, %v836_v22  ;;  %v822_v26 = vrot.slane %v783_v24, %v1995_v55 }
 0x26e   : > { %v785_v27 = vpop.xlane.xlu0 %784 }
 0x26f   : > { %v840_v28 = vsel %vm839_vm5, %v822_v26, %v838_v25  ;;  %v826_v29 = vrot.slane %v785_v27, %v1995_v55 }
 0x270   : > { %v787_v30 = vpop.xlane.xlu1 %786 }
 0x271   : > { %v842_v31 = vsel %vm841_vm6, %v826_v29, %v840_v28  ;;  %v830_v32 = vrot.slane %v787_v30, %v1995_v55 }
 0x273   : > { %v844_v33 = vsel %vm843_vm7, %v830_v32, %v842_v31 }
 0x274   : > { %1230 = vmatmul.mubr.msk.f32.vlgmr.msra.gmra.mrb[2].mxu0 %vm845_vm8, %v844_v33 }
 0x347   : > { %v914_v34 = vpop.f32.mrb[2].mxu0 }
 0x348   : > { %924 = vst [vmem:[%s423_s23] sm:$0xff] %v914_v34  ;;  %v1231_v35 = vpop.f32.mrb[3].mxu0 }
 0x349   : > { %1570 = shalt.err (!%p1567_p8)
}
 0x34a   : > { %s1571_s8 = scalar_lea.hbm %s2020_s13, 128  ;;  %s1575_s28 = scalar_lea.hbm %s2074_s7, 256 }
 0x34b   : > { %p1572_p0 = scmp.ne.s32.totalorder %s2020_s13, %s1571_s8  ;;  %p1576_p7 = scmp.lt.u32.totalorder %s2020_s13, %s2074_s7 }
 0x34c   : > { %p1577_p13 = scmp.lt.u32.totalorder %s1575_s28, %s1571_s8  ;;  %p1579_p2 = scmp.lt.u32.totalorder %s1571_s8, %s2020_s13 }
 0x34d   : > { %p1573_p5 = pnand %p1572_p0, %p2126_p4 }
 0x34e   : > { %p1578_p9 = por %p1577_p13, %p1576_p7 }
 0x34f   : > { %p1574_p12 = pneg %p1573_p5 }
 0x350   : > { %p1580_p1 = por %p1579_p2, %p1578_p9 }
 0x352   : > { %p1581_p3 = pnand %p1580_p1, %p1574_p12 }
 0x354   : > { %1584 = shalt.err (!%p1581_p3)
}
 0x355   : > { %1294 = dma.vmem_to_hbm [thread:$0]  (%p2126_p4), %s2015_s18, 128, %s2020_s13, %s926_s12  }
 0x356 PF: > { %s2127_s10 = sld [smem:[#allocation19_spill]]  ;;  %s2128_s30 = sld [smem:[#allocation18_spill]] }
 0x357   : > { %s952_s9 = sand.u32 1, %s1627_s24  }
 0x358   : > { %s953_s1 = scalar_lea.sflag [#allocation5], %s952_s9 }
 0x35c   : > { %p2129_p11 = scmp.ne.s32.totalorder %s2127_s10, 0  ;;  %p2130_p10 = scmp.ge.s32.totalorder %s2128_s30, 2 }
 0x35e   : > { %p1314_p6 = pnand %p2130_p10, %p2129_p11 }
 0x360   : > { %1622 = dma.done.wait (!%p1314_p6), %s953_s1, 128  }
 0x361   : > { %1624 = vsyncadd (!%p1314_p6), %s953_s1, 4294967168  ;;  %s27_s29 = sadd.s32 1, %s2128_s30   ;;  %s2131_s19 = sld [smem:[#allocation21_spill]] }
 0x362   : > { %p24_p8 = scmp.ge.s32.totalorder %s27_s29, 4   ;;  %s2132_s27 = sld [smem:[#allocation17_spill]] }
 0x363   : > { %s2133_s28 = sld [smem:[#allocation20_spill]]  ;;  %s2134_s24 = smov %s1631_s25 }
 0x364   : > { %s2135_s25 = smov %s1635_s26  ;;  %26 = sbr.rel (!%p24_p8) target bundleno = 13 (0xd), region = 133 }
 0x367   : > { %s2136_s26 = smov %s2131_s19 }
 0x36b   :  { %958 = vsyncpa [#allocation4], 1 }
 0x36c   :  { %960 = vsyncpa [#allocation4 + $0x1], 1 }
 0x36d   :  { %961 = vsyncpa [#allocation7], 1 }
 0x36e   :  { %963 = vsyncpa [#allocation7 + $0x1], 1 }
 0x36f   :  { %964 = vsyncpa [#allocation10], 1 }
 0x370   :  { %965 = vsyncpa [#allocation5], 1 }
 0x371   :  { %967 = vsyncpa [#allocation5 + $0x1], 1 }

</bundles_post_ra>
